<compile_context>
chip_gen: v7x
topology: tpu7x:2x2x1
jax: 0.10.0
libtpu: 0.0.40
codegen_flags: <defaults>
</compile_context>

<pallas_src>
import functools
import math

import jax
import jax.numpy as jnp
from jax import lax
from jax.experimental import pallas as pl
from jax.experimental.pallas import tpu as pltpu


# Set to jnp.bfloat16 for v6e/v7x MXU speed at larger dims (small numeric delta
# vs the f32 PyTorch reference); None keeps full f32 operands.
MXU_DTYPE = None
# EUP approx reciprocal for the softmax denominator (free issue slot).
_APPROX_RECIP = True


# ----------------------------- in-kernel math helpers -----------------------------

def _mm(a, b):
    if MXU_DTYPE is not None:
        a = a.astype(MXU_DTYPE)
        b = b.astype(MXU_DTYPE)
    return jnp.dot(a, b, preferred_element_type=jnp.float32)


def _mm_t(a, b):
    # a @ b.T (contract on last dims) without materializing a transpose.
    if MXU_DTYPE is not None:
        a = a.astype(MXU_DTYPE)
        b = b.astype(MXU_DTYPE)
    return lax.dot_general(a, b, (((1,), (1,)), ((), ())),
                           preferred_element_type=jnp.float32)


def _softmax_rows(s):
    s = s - jnp.max(s, axis=-1, keepdims=True)
    p = jnp.exp(s)
    return p * pl.reciprocal(jnp.sum(p, axis=-1, keepdims=True), approx=_APPROX_RECIP)


def _attn_self(x, wqkv, bqkv, wo, bo):
    """Self-attention block (k == v == q input).  wqkv is the fused (D,3D)
    projection; the 1/sqrt(D) scale is already folded into its q slice."""
    D = wo.shape[0]
    qkv = _mm(x, wqkv) + bqkv
    q, k, v = qkv[:, :D], qkv[:, D:2 * D], qkv[:, 2 * D:]
    p = _softmax_rows(_mm_t(q, k))
    return x + _mm(_mm(p, v), wo) + bo


def _attn_cross(xq, xkv, kmask, wq, bq, wkv, bkv, wo, bo):
    """Cross-attention block.  wq/bq carry the folded 1/sqrt(D) scale, wkv is
    the fused (D,2D) k|v projection, kmask is an additive (1,Lk) key mask."""
    D = wq.shape[1]
    q = _mm(xq, wq) + bq
    kv = _mm(xkv, wkv) + bkv
    k, v = kv[:, :D], kv[:, D:]
    p = _softmax_rows(_mm_t(q, k) + kmask)
    return xq + _mm(_mm(p, v), wo) + bo


# ----------------------------- weight preparation (XLA glue, tiny) -----------------------------

def _prep_self_qkv(p, D):
    s = 1.0 / math.sqrt(D)
    wqkv = jnp.concatenate([p['wq']['w'] * s, p['wk']['w'], p['wv']['w']], axis=1)
    bqkv = jnp.concatenate([p['wq']['b'] * s, p['wk']['b'], p['wv']['b']]).reshape(1, 3 * D)
    return wqkv, bqkv, p['wo']['w'], p['wo']['b'].reshape(1, D)


def _prep_cross_stack(ps, D):
    s = 1.0 / math.sqrt(D)
    wq = jnp.stack([p['wq']['w'] * s for p in ps])
    bq = jnp.stack([(p['wq']['b'] * s).reshape(1, D) for p in ps])
    wkv = jnp.stack([jnp.concatenate([p['wk']['w'], p['wv']['w']], axis=1) for p in ps])
    bkv = jnp.stack([jnp.concatenate([p['wk']['b'], p['wv']['b']]).reshape(1, 2 * D) for p in ps])
    wo = jnp.stack([p['wo']['w'] for p in ps])
    bo = jnp.stack([p['wo']['b'].reshape(1, D) for p in ps])
    return wq, bq, wkv, bkv, wo, bo


def _key_mask(lengths, L):
    return jnp.stack([jnp.where(jnp.arange(L) < l, 0.0, -1e30)
                      .astype(jnp.float32).reshape(1, L) for l in lengths])


# ----------------------------- generic fused linear -----------------------------

def _linear_kernel(x_ref, w_ref, b_ref, o_ref):
    o_ref[...] = (_mm(x_ref[...], w_ref[...]) + b_ref[...]).astype(o_ref.dtype)


def linear(x, w, b, block_rows=512):
    """x: (..., Din) @ w: (Din, Dout) + b.  Row-tiled (512 rows / block) so long
    token counts stay near the HBM roofline and VMEM-safe on v7x."""
    lead = x.shape[:-1]
    din, dout = w.shape
    x2 = x.reshape(-1, din)
    n = x2.shape[0]
    bn = n if n <= block_rows else block_rows
    out = pl.pallas_call(
        _linear_kernel,
        out_shape=jax.ShapeDtypeStruct((n, dout), jnp.float32),
        grid=(pl.cdiv(n, bn),),
        in_specs=[pl.BlockSpec((bn, din), lambda i: (i, 0)),
                  pl.BlockSpec((din, dout), lambda i: (0, 0)),
                  pl.BlockSpec((1, dout), lambda i: (0, 0))],
        out_specs=pl.BlockSpec((bn, dout), lambda i: (i, 0)),
        compiler_params=pltpu.CompilerParams(dimension_semantics=("parallel",)),
    )(x2, w, b.reshape(1, dout))
    return out.reshape(lead + (dout,))


# ----------------------------- fused conv1d + unimodal encoder -----------------------------

def _conv_unimodal_kernel(K, x_ref, cw_ref, cb_ref, wqkv_ref, bqkv_ref,
                          wo_ref, bo_ref, wc_ref, bc_ref, tok_ref, cls_ref):
    Lout = tok_ref.shape[1]
    x = x_ref[0]                                   # (Lpad, Cin) padded input
    conv = cb_ref[...] + _mm(x[0:Lout, :], cw_ref[0])
    for k in range(1, K):                          # K shifted MXU accumulates
        conv = conv + _mm(x[k:k + Lout, :], cw_ref[k])
    tokens = _attn_self(conv, wqkv_ref[...], bqkv_ref[...], wo_ref[...], bo_ref[...])
    tok_ref[0] = tokens.astype(tok_ref.dtype)
    pooled = jnp.mean(tokens, axis=0, keepdims=True)
    cls_ref[0] = (_mm(pooled, wc_ref[...]) + bc_ref[...]).astype(cls_ref.dtype)


def conv_unimodal_feature(p_conv, p_enc, x, padding=1):
    """Fused {Conv1d (stride=1) + self-attn encoder + mean-pool + cls proj},
    one pallas_call, grid over batch.  Returns (cls, tokens)."""
    B, L, Cin = x.shape
    K, _, D = p_conv['w'].shape
    Lout = L + 2 * padding - K + 1
    Dout = p_enc['wc']['w'].shape[1]
    x_pad = jnp.pad(x, ((0, 0), (padding, padding), (0, 0)))
    Lpad = x_pad.shape[1]
    wqkv, bqkv, wo, bo = _prep_self_qkv(p_enc, D)
    w2 = lambda s: pl.BlockSpec(s, lambda b: (0, 0))
    tokens, cls = pl.pallas_call(
        functools.partial(_conv_unimodal_kernel, K),
        out_shape=(jax.ShapeDtypeStruct((B, Lout, D), jnp.float32),
                   jax.ShapeDtypeStruct((B, 1, Dout), jnp.float32)),
        grid=(B,),
        in_specs=[pl.BlockSpec((1, Lpad, Cin), lambda b: (b, 0, 0)),
                  pl.BlockSpec((K, Cin, D), lambda b: (0, 0, 0)), w2((1, D)),
                  w2((D, 3 * D)), w2((1, 3 * D)),
                  w2((D, D)), w2((1, D)),
                  w2((D, Dout)), w2((1, Dout))],
        out_specs=(pl.BlockSpec((1, Lout, D), lambda b: (b, 0, 0)),
                   pl.BlockSpec((1, 1, Dout), lambda b: (b, 0, 0))),
        compiler_params=pltpu.CompilerParams(dimension_semantics=("parallel",)),
    )(x_pad, p_conv['w'], p_conv['b'].reshape(1, D), wqkv, bqkv, wo, bo,
      p_enc['wc']['w'], p_enc['wc']['b'].reshape(1, Dout))
    return cls[:, 0, :], tokens


def _unimodal_kernel(x_ref, wqkv_ref, bqkv_ref, wo_ref, bo_ref, wc_ref, bc_ref,
                     tok_ref, cls_ref):
    tokens = _attn_self(x_ref[0], wqkv_ref[...], bqkv_ref[...], wo_ref[...], bo_ref[...])
    tok_ref[0] = tokens.astype(tok_ref.dtype)
    pooled = jnp.mean(tokens, axis=0, keepdims=True)
    cls_ref[0] = (_mm(pooled, wc_ref[...]) + bc_ref[...]).astype(cls_ref.dtype)


def unimodal_feature(p_enc, x):
    """Fused self-attention encoder + mean-pool + cls projection (no conv)."""
    B, L, D = x.shape
    Dout = p_enc['wc']['w'].shape[1]
    wqkv, bqkv, wo, bo = _prep_self_qkv(p_enc, D)
    w2 = lambda s: pl.BlockSpec(s, lambda b: (0, 0))
    tokens, cls = pl.pallas_call(
        _unimodal_kernel,
        out_shape=(jax.ShapeDtypeStruct((B, L, D), jnp.float32),
                   jax.ShapeDtypeStruct((B, 1, Dout), jnp.float32)),
        grid=(B,),
        in_specs=[pl.BlockSpec((1, L, D), lambda b: (b, 0, 0)),
                  w2((D, 3 * D)), w2((1, 3 * D)),
                  w2((D, D)), w2((1, D)),
                  w2((D, Dout)), w2((1, Dout))],
        out_specs=(pl.BlockSpec((1, L, D), lambda b: (b, 0, 0)),
                   pl.BlockSpec((1, 1, Dout), lambda b: (b, 0, 0))),
        compiler_params=pltpu.CompilerParams(dimension_semantics=("parallel",)),
    )(x, wqkv, bqkv, wo, bo, p_enc['wc']['w'], p_enc['wc']['b'].reshape(1, Dout))
    return cls[:, 0, :], tokens


# ----------------------------- stacked cross-attention blocks -----------------------------

def _stacked_cross_kernel(xq_ref, xkv_ref, m_ref, wq_ref, bq_ref, wkv_ref, bkv_ref,
                          wo_ref, bo_ref, o_ref):
    o_ref[0, 0] = _attn_cross(xq_ref[0, 0], xkv_ref[0, 0], m_ref[0],
                              wq_ref[0], bq_ref[0], wkv_ref[0], bkv_ref[0],
                              wo_ref[0], bo_ref[0]).astype(o_ref.dtype)


def stacked_cross(enc_ps, pairs):
    """N independent cross-attention blocks (different weights AND different
    (xq, xkv) inputs) batched into ONE pallas_call, grid=(N, B).  Sequences are
    zero-padded to the max length; key padding is masked additively and padded
    query rows are ignored downstream.  Returns (out (N,B,Lq,D), q_lengths)."""
    N = len(enc_ps)
    B, _, D = pairs[0][0].shape
    lq = [p[0].shape[1] for p in pairs]
    lk = [p[1].shape[1] for p in pairs]
    Lq, Lk = max(lq), max(lk)
    xq = jnp.stack([jnp.pad(p[0], ((0, 0), (0, Lq - p[0].shape[1]), (0, 0))) for p in pairs])
    xkv = jnp.stack([jnp.pad(p[1], ((0, 0), (0, Lk - p[1].shape[1]), (0, 0))) for p in pairs])
    kmask = _key_mask(lk, Lk)
    wq, bq, wkv, bkv, wo, bo = _prep_cross_stack(enc_ps, D)
    wsp = lambda s: pl.BlockSpec(s, lambda n, b: (n, 0, 0))
    out = pl.pallas_call(
        _stacked_cross_kernel,
        out_shape=jax.ShapeDtypeStruct((N, B, Lq, D), jnp.float32),
        grid=(N, B),
        in_specs=[pl.BlockSpec((1, 1, Lq, D), lambda n, b: (n, b, 0, 0)),
                  pl.BlockSpec((1, 1, Lk, D), lambda n, b: (n, b, 0, 0)),
                  wsp((1, 1, Lk)),
                  wsp((1, D, D)), wsp((1, 1, D)),
                  wsp((1, D, 2 * D)), wsp((1, 1, 2 * D)),
                  wsp((1, D, D)), wsp((1, 1, D))],
        out_specs=pl.BlockSpec((1, 1, Lq, D), lambda n, b: (n, b, 0, 0)),
        compiler_params=pltpu.CompilerParams(
            dimension_semantics=("parallel", "parallel")),
    )(xq, xkv, kmask, wq, bq, wkv, bkv, wo, bo)
    return out, lq


def _stacked_mm_kernel(xq_ref, xkv_ref, m_ref, qp_ref, wq_ref, bq_ref, wkv_ref,
                       bkv_ref, wo_ref, bo_ref, m1_ref, mb1_ref, m2_ref, mb2_ref,
                       pool_ref, proj_ref):
    tokens = _attn_cross(xq_ref[0, 0], xkv_ref[0, 0], m_ref[0],
                         wq_ref[0], bq_ref[0], wkv_ref[0], bkv_ref[0],
                         wo_ref[0], bo_ref[0])
    # masked mean over valid query rows (qp holds 1/len for valid rows, else 0)
    pooled = jnp.sum(tokens * qp_ref[0], axis=0, keepdims=True)
    pool_ref[0, 0] = pooled.astype(pool_ref.dtype)
    h = jnp.maximum(_mm(pooled, m1_ref[0]) + mb1_ref[0], 0.0)
    proj_ref[0, 0] = (_mm(h, m2_ref[0]) + mb2_ref[0]).astype(proj_ref.dtype)


def stacked_multimodal(enc_ps, mlp_ps, xq_list, xkv_stack, kv_lengths):
    """N fused {cross-attn + mean-pool + 2-layer MLP head} blocks in ONE
    pallas_call, grid=(N, B).  Returns (pooled (N,B,D), proj (N,B,Hp))."""
    N = len(enc_ps)
    B, _, D = xq_list[0].shape
    lq = [x.shape[1] for x in xq_list]
    Lq = max(lq)
    Lk = xkv_stack.shape[2]
    H = mlp_ps[0]['l1']['w'].shape[1]
    Hp = mlp_ps[0]['l2']['w'].shape[1]
    xq = jnp.stack([jnp.pad(x, ((0, 0), (0, Lq - x.shape[1]), (0, 0))) for x in xq_list])
    kmask = _key_mask(kv_lengths, Lk)
    qpool = jnp.stack([jnp.where(jnp.arange(Lq) < l, 1.0 / l, 0.0)
                       .astype(jnp.float32).reshape(Lq, 1) for l in lq])
    wq, bq, wkv, bkv, wo, bo = _prep_cross_stack(enc_ps, D)
    m1 = jnp.stack([m['l1']['w'] for m in mlp_ps])
    mb1 = jnp.stack([m['l1']['b'].reshape(1, H) for m in mlp_ps])
    m2 = jnp.stack([m['l2']['w'] for m in mlp_ps])
    mb2 = jnp.stack([m['l2']['b'].reshape(1, Hp) for m in mlp_ps])
    wsp = lambda s: pl.BlockSpec(s, lambda n, b: (n, 0, 0))
    pooled, proj = pl.pallas_call(
        _stacked_mm_kernel,
        out_shape=(jax.ShapeDtypeStruct((N, B, 1, D), jnp.float32),
                   jax.ShapeDtypeStruct((N, B, 1, Hp), jnp.float32)),
        grid=(N, B),
        in_specs=[pl.BlockSpec((1, 1, Lq, D), lambda n, b: (n, b, 0, 0)),
                  pl.BlockSpec((1, 1, Lk, D), lambda n, b: (n, b, 0, 0)),
                  wsp((1, 1, Lk)), wsp((1, Lq, 1)),
                  wsp((1, D, D)), wsp((1, 1, D)),
                  wsp((1, D, 2 * D)), wsp((1, 1, 2 * D)),
                  wsp((1, D, D)), wsp((1, 1, D)),
                  wsp((1, D, H)), wsp((1, 1, H)),
                  wsp((1, H, Hp)), wsp((1, 1, Hp))],
        out_specs=(pl.BlockSpec((1, 1, 1, D), lambda n, b: (n, b, 0, 0)),
                   pl.BlockSpec((1, 1, 1, Hp), lambda n, b: (n, b, 0, 0))),
        compiler_params=pltpu.CompilerParams(
            dimension_semantics=("parallel", "parallel")),
    )(xq, xkv_stack, kmask, qpool, wq, bq, wkv, bkv, wo, bo, m1, mb1, m2, mb2)
    return pooled[:, :, 0, :], proj[:, :, 0, :]


# ----------------------------- stacked post-* heads -----------------------------

def _post_heads_kernel(x_ref, w1_ref, b1_ref, w2_ref, b2_ref, w3_ref, b3_ref,
                       m1_ref, mb1_ref, m2_ref, mb2_ref, out_ref, h_ref, proj_ref):
    # TODO(synk): dropout before layer_1 is identity at inference and omitted.
    x = x_ref[0]
    h = jnp.maximum(_mm(x, w1_ref[0]) + b1_ref[0], 0.0)
    x2 = jnp.maximum(_mm(h, w2_ref[0]) + b2_ref[0], 0.0)
    out_ref[0] = (_mm(x2, w3_ref[0]) + b3_ref[0]).astype(out_ref.dtype)
    h_ref[0] = h.astype(h_ref.dtype)
    mh = jnp.maximum(_mm(h, m1_ref[0]) + mb1_ref[0], 0.0)
    proj_ref[0] = (_mm(mh, m2_ref[0]) + mb2_ref[0]).astype(proj_ref.dtype)


def post_heads(xs, heads):
    """Run N post_* heads (3 linears + 2-layer MLP projection head) in ONE
    pallas_call, grid=(N,).  Per-head dims are zero-padded to group maxima
    (zero weight rows/cols keep the math exact); outputs are sliced back to the
    true per-head dims in the wrapper.  Each heads[i] = (p1, p2, p3, mlp)."""
    N = len(xs)
    B = xs[0].shape[0]
    dins = [x.shape[1] for x in xs]
    h1s = [h[0]['w'].shape[1] for h in heads]
    h2s = [h[1]['w'].shape[1] for h in heads]
    outs = [h[2]['w'].shape[1] for h in heads]
    hms = [h[3]['l1']['w'].shape[1] for h in heads]
    hps = [h[3]['l2']['w'].shape[1] for h in heads]
    Din, H1, H2, O, Hm, Hp = (max(v) for v in (dins, h1s, h2s, outs, hms, hps))

    def pw(w, r, c):
        return jnp.pad(w, ((0, r - w.shape[0]), (0, c - w.shape[1])))

    def pb(b, c):
        return jnp.pad(b, (0, c - b.shape[0])).reshape(1, c)

    x_st = jnp.stack([jnp.pad(x, ((0, 0), (0, Din - x.shape[1]))) for x in xs])
    w1 = jnp.stack([pw(h[0]['w'], Din, H1) for h in heads])
    b1 = jnp.stack([pb(h[0]['b'], H1) for h in heads])
    w2 = jnp.stack([pw(h[1]['w'], H1, H2) for h in heads])
    b2 = jnp.stack([pb(h[1]['b'], H2) for h in heads])
    w3 = jnp.stack([pw(h[2]['w'], H2, O) for h in heads])
    b3 = jnp.stack([pb(h[2]['b'], O) for h in heads])
    m1 = jnp.stack([pw(h[3]['l1']['w'], H1, Hm) for h in heads])
    mb1 = jnp.stack([pb(h[3]['l1']['b'], Hm) for h in heads])
    m2 = jnp.stack([pw(h[3]['l2']['w'], Hm, Hp) for h in heads])
    mb2 = jnp.stack([pb(h[3]['l2']['b'], Hp) for h in heads])

    wsp = lambda s: pl.BlockSpec(s, lambda n: (n, 0, 0))
    out, hh, pp = pl.pallas_call(
        _post_heads_kernel,
        out_shape=(jax.ShapeDtypeStruct((N, B, O), jnp.float32),
                   jax.ShapeDtypeStruct((N, B, H1), jnp.float32),
                   jax.ShapeDtypeStruct((N, B, Hp), jnp.float32)),
        grid=(N,),
        in_specs=[wsp((1, B, Din)),
                  wsp((1, Din, H1)), wsp((1, 1, H1)),
                  wsp((1, H1, H2)), wsp((1, 1, H2)),
                  wsp((1, H2, O)), wsp((1, 1, O)),
                  wsp((1, H1, Hm)), wsp((1, 1, Hm)),
                  wsp((1, Hm, Hp)), wsp((1, 1, Hp))],
        out_specs=(wsp((1, B, O)), wsp((1, B, H1)), wsp((1, B, Hp))),
        compiler_params=pltpu.CompilerParams(dimension_semantics=("parallel",)),
    )(x_st, w1, b1, w2, b2, w3, b3, m1, mb1, m2, mb2)
    # TODO(synk): packing (logits|h|proj) into one 128-lane slab (lane-dense
    # store) skipped to avoid in-kernel sub-128 lane concat; cold 3-step grid.
    return [(out[i, :, :outs[i]], hh[i, :, :h1s[i]], pp[i, :, :hps[i]])
            for i in range(N)]


# ------------------------ parameter init (simplified sub-modules) ------------------------

def init_linear(key, din, dout):
    k1, k2 = jax.random.split(key)
    return {'w': 0.02 * jax.random.normal(k1, (din, dout), jnp.float32),
            'b': 0.02 * jax.random.normal(k2, (dout,), jnp.float32)}


def init_trans_encoder(key, d_in, d_out):
    # TODO(synk): Trans_Encoder source not provided; a single cross-attention block
    # (q/k/v projections -> SDPA -> output projection + residual) stands in.
    ks = jax.random.split(key, 5)
    return {'wq': init_linear(ks[0], d_in, d_in),
            'wk': init_linear(ks[1], d_in, d_in),
            'wv': init_linear(ks[2], d_in, d_in),
            'wo': init_linear(ks[3], d_in, d_in),
            'wc': init_linear(ks[4], d_in, d_out)}


def init_mlp(key, d):
    # TODO(synk): MLP source not provided; 2-layer ReLU projection head stands in.
    k1, k2 = jax.random.split(key)
    return {'l1': init_linear(k1, d, d), 'l2': init_linear(k2, d, d)}


# ------------------------ contrastive losses (tiny BxB, plain JAX) ------------------------

def supcon_loss(features, labels, temperature=0.07):
    # TODO(synk): SCL_SupConLoss source not provided; standard SupCon loss stands in.
    f = features.reshape(features.shape[0], -1)
    f = f / (jnp.linalg.norm(f, axis=-1, keepdims=True) + 1e-8)
    sim = (f @ f.T) / temperature
    n = f.shape[0]
    eye = jnp.eye(n, dtype=jnp.float32)
    pos_mask = (labels[:, None] == labels[None, :]).astype(jnp.float32) * (1.0 - eye)
    sim = sim - jnp.max(sim, axis=1, keepdims=True)
    exp_sim = jnp.exp(sim) * (1.0 - eye)
    log_prob = sim - jnp.log(jnp.sum(exp_sim, axis=1, keepdims=True) + 1e-8)
    denom = jnp.maximum(jnp.sum(pos_mask, axis=1), 1.0)
    return -jnp.mean(jnp.sum(pos_mask * log_prob, axis=1) / denom)


def paircon_loss(z1, z2, temperature=0.5):
    # TODO(synk): SSCL_PairConLoss source not provided; NT-Xent pair loss stands in.
    z1 = z1 / (jnp.linalg.norm(z1, axis=-1, keepdims=True) + 1e-8)
    z2 = z2 / (jnp.linalg.norm(z2, axis=-1, keepdims=True) + 1e-8)
    sim = (z1 @ z2.T) / temperature
    logp = sim - jax.scipy.special.logsumexp(sim, axis=1, keepdims=True)
    return -jnp.mean(jnp.diag(logp))


# ----------------------------- CLMSA model -----------------------------

def init_clmsa(key, cfg):
    keys = iter(jax.random.split(key, 64))
    D = cfg['transformer_dim']
    p = {}
    p['align_t'] = init_linear(next(keys), cfg['text_dim'], D)
    p['conv_a'] = {'w': 0.02 * jax.random.normal(next(keys), (cfg['K'], cfg['audio_dim'], D), jnp.float32),
                   'b': jnp.zeros((D,), jnp.float32)}
    p['conv_v'] = {'w': 0.02 * jax.random.normal(next(keys), (cfg['K'], cfg['vision_dim'], D), jnp.float32),
                   'b': jnp.zeros((D,), jnp.float32)}
    p['enc_a'] = init_trans_encoder(next(keys), D, cfg['audio_out'])
    p['enc_v'] = init_trans_encoder(next(keys), D, cfg['video_out'])
    # post-* heads (dropout is identity at inference)
    p['post_t1'] = init_linear(next(keys), cfg['text_dim'], cfg['post_text_dim'])
    p['post_t2'] = init_linear(next(keys), cfg['post_text_dim'], cfg['post_text_dim'])
    p['post_t3'] = init_linear(next(keys), cfg['post_text_dim'], cfg['output_dim'])
    p['post_a1'] = init_linear(next(keys), cfg['audio_out'], cfg['post_audio_dim'])
    p['post_a2'] = init_linear(next(keys), cfg['post_audio_dim'], cfg['post_audio_dim'])
    p['post_a3'] = init_linear(next(keys), cfg['post_audio_dim'], cfg['output_dim'])
    p['post_v1'] = init_linear(next(keys), cfg['video_out'], cfg['post_video_dim'])
    p['post_v2'] = init_linear(next(keys), cfg['post_video_dim'], cfg['post_video_dim'])
    p['post_v3'] = init_linear(next(keys), cfg['post_video_dim'], cfg['output_dim'])
    # note: original code constructs MLP(text_input_dim) but applies it to post_text_dim
    # features; heads are sized to the tensors actually fed to them.
    p['mlp_t'] = init_mlp(next(keys), cfg['post_text_dim'])
    p['mlp_a'] = init_mlp(next(keys), cfg['post_audio_dim'])
    p['mlp_v'] = init_mlp(next(keys), cfg['post_video_dim'])
    # cross transformers
    for name in ['t_ij', 't_ji', 't_ki', 't_ik', 't_jk', 't_kj',
                 't_ijk', 't_jik', 't_kij', 't_ikj', 't_jki', 't_kji']:
        p[name] = init_trans_encoder(next(keys), D, D)
    for name in ['ijk_mlp', 'jik_mlp', 'kij_mlp', 'ikj_mlp', 'jki_mlp', 'kji_mlp']:
        p[name] = init_mlp(next(keys), D)
    p['fusion_enc'] = init_trans_encoder(next(keys), 6 * D, D)
    p['post_f1'] = init_linear(next(keys), D, D)
    p['post_f2'] = init_linear(next(keys), D, cfg['post_fusion_dim'])
    p['post_f3'] = init_linear(next(keys), cfg['post_fusion_dim'], cfg['output_dim'])
    p['fusion_mlp'] = init_mlp(next(keys), D)
    return p


def clmsa_forward(params, text_embed, audio, vision,
                  multi_labels, text_labels, audio_labels, vision_labels):
    # ---------------- unimodal_encoding ----------------
    # TODO(synk): BertTextEncoder (pretrained BERT) has no clean Pallas equivalent;
    # text_embed is taken as the already-encoded BERT hidden states (B, T, text_dim).
    # config: aligned=False, lstm_encoder=False -> conv1d + Trans_Encoder path.
    text_cls = text_embed[:, 0, :]
    text_tokens = linear(text_embed[:, 1:-1, :], params['align_t']['w'],
                         params['align_t']['b'])
    a_cls, a_tokens = conv_unimodal_feature(params['conv_a'], params['enc_a'], audio)
    v_cls, v_tokens = conv_unimodal_feature(params['conv_v'], params['enc_v'], vision)

    # ---------------- unimodal_CL: 3 post_* heads in ONE pallas_call ----------------
    (out_t, text_h, text_p), (out_a, audio_h, audio_p), (out_v, vision_h, vision_p) = \
        post_heads(
            [text_cls, a_cls, v_cls],
            [(params['post_t1'], params['post_t2'], params['post_t3'], params['mlp_t']),
             (params['post_a1'], params['post_a2'], params['post_a3'], params['mlp_a']),
             (params['post_v1'], params['post_v2'], params['post_v3'], params['mlp_v'])])
    uni_scl_loss = (supcon_loss(text_p[:, None, :], text_labels)
                    + supcon_loss(audio_p[:, None, :], audio_labels)
                    + supcon_loss(vision_p[:, None, :], vision_labels))

    # ---------- multimodal_CL (modal_based == 0 -> multimodal_CL_first) ----------
    t, a, v = text_tokens, a_tokens, v_tokens
    # 6 pairwise cross transformers -> ONE pallas_call (order: jk, kj, ik, ki, ij, ji)
    cross, cross_len = stacked_cross(
        [params[n] for n in ('t_jk', 't_kj', 't_ik', 't_ki', 't_ij', 't_ji')],
        [(a, v), (v, a), (t, v), (v, t), (t, a), (a, t)])
    # 6 {cross + pool + MLP} blocks -> ONE pallas_call (order: ijk, ikj, jik, jki, kij, kji)
    pooled, proj = stacked_multimodal(
        [params[n] for n in ('t_ijk', 't_ikj', 't_jik', 't_jki', 't_kij', 't_kji')],
        [params[n] for n in ('ijk_mlp', 'ikj_mlp', 'jik_mlp', 'jki_mlp', 'kij_mlp', 'kji_mlp')],
        [t, t, a, a, v, v], cross, cross_len)
    sscl_loss = (paircon_loss(proj[0], proj[1])
                 + paircon_loss(proj[2], proj[3])
                 + paircon_loss(proj[4], proj[5]))

    B = text_cls.shape[0]
    D = pooled.shape[-1]
    multi_features = jnp.transpose(pooled, (1, 0, 2)).reshape(B, 6 * D)  # [ijk|ikj|jik|jki|kij|kji]

    fusion_cls, _ = unimodal_feature(params['fusion_enc'], multi_features[:, None, :])
    ((output_fusion, fusion_h, fusion_p),) = post_heads(
        [fusion_cls],
        [(params['post_f1'], params['post_f2'], params['post_f3'], params['fusion_mlp'])])
    scl_f = supcon_loss(fusion_p[:, None, :], multi_labels)
    multi_scl_loss = sscl_loss + scl_f

    features = {'Feature_T': text_h, 'Feature_A': audio_h,
                'Feature_V': vision_h, 'Feature_M': fusion_h}
    return ((out_t, out_a, out_v), uni_scl_loss, (multi_scl_loss, output_fusion), features)


# ----------------------------- demo -----------------------------

if __name__ == "__main__":
    cfg = dict(text_dim=32, audio_dim=16, vision_dim=16, transformer_dim=32,
               audio_out=16, video_out=16, post_text_dim=16, post_audio_dim=16,
               post_video_dim=16, post_fusion_dim=16, output_dim=3, K=3)

    key = jax.random.PRNGKey(0)
    kp, kt, ka, kv, kl = jax.random.split(key, 5)
    params = init_clmsa(kp, cfg)

    B, T, La, Lv = 2, 10, 8, 8
    text_embed = jax.random.normal(kt, (B, T, cfg['text_dim']), jnp.float32)
    audio = jax.random.normal(ka, (B, La, cfg['audio_dim']), jnp.float32)
    vision = jax.random.normal(kv, (B, Lv, cfg['vision_dim']), jnp.float32)
    kl1, kl2, kl3, kl4 = jax.random.split(kl, 4)
    multi_labels = jax.random.randint(kl1, (B,), 0, cfg['output_dim'])
    text_labels = jax.random.randint(kl2, (B,), 0, cfg['output_dim'])
    audio_labels = jax.random.randint(kl3, (B,), 0, cfg['output_dim'])
    vision_labels = jax.random.randint(kl4, (B,), 0, cfg['output_dim'])

    out = clmsa_forward(params, text_embed, audio, vision,
                        multi_labels, text_labels, audio_labels, vision_labels)
    jax.block_until_ready(out)
    print("KERNEL_OK")
</pallas_src>

<mosaic_0001>
module attributes {stable_mosaic.version = 11 : i64} {
  func.func @_linear_kernel(%arg0: i32, %arg1: memref<16x32xf32, #tpu.memory_space<vmem>>, %arg2: memref<32x32xf32, #tpu.memory_space<vmem>>, %arg3: memref<1x32xf32, #tpu.memory_space<vmem>>, %arg4: memref<16x32xf32, #tpu.memory_space<vmem>>) attributes {dimension_semantics = [#tpu.dimension_semantics<parallel>], iteration_bounds = array<i64: 1>, scalar_prefetch = 0 : i64, scratch_operands = 0 : i64, tpu.core_type = #tpu.core_type<tc>, window_params = [{transform_indices = @transform_0, window_bounds = array<i64: 16, 32>}, {pipeline_mode = #tpu.pipeline_mode<synchronous>, transform_indices = @transform_1, window_bounds = array<i64: 32, 32>}, {pipeline_mode = #tpu.pipeline_mode<synchronous>, transform_indices = @transform_2, window_bounds = array<i64: 1, 32>}, {transform_indices = @transform_3, window_bounds = array<i64: 16, 32>}]} {
    %c0 = arith.constant 0 : index
    %c0_0 = arith.constant 0 : index
    %0 = vector.load %arg1[%c0, %c0_0] : memref<16x32xf32, #tpu.memory_space<vmem>>, vector<16x32xf32>
    %c0_1 = arith.constant 0 : index
    %c0_2 = arith.constant 0 : index
    %1 = vector.load %arg2[%c0_1, %c0_2] : memref<32x32xf32, #tpu.memory_space<vmem>>, vector<32x32xf32>
    %cst = arith.constant dense<0.000000e+00> : vector<16x32xf32>
    %2 = tpu.matmul %0, %1, %cst {dimension_numbers = #tpu.dot_dimension_numbers<[1], [0], [0], [1], [0, 0, 1, 1], [], []>} : vector<16x32xf32>, vector<32x32xf32>, vector<16x32xf32> -> vector<16x32xf32>
    %c0_3 = arith.constant 0 : index
    %c0_4 = arith.constant 0 : index
    %3 = vector.load %arg3[%c0_3, %c0_4] : memref<1x32xf32, #tpu.memory_space<vmem>>, vector<1x32xf32>
    %4 = vector.broadcast %3 : vector<1x32xf32> to vector<16x32xf32>
    %5 = arith.addf %2, %4 : vector<16x32xf32>
    %c0_5 = arith.constant 0 : index
    %c0_6 = arith.constant 0 : index
    %6 = vector.load %arg4[%c0_5, %c0_6] : memref<16x32xf32, #tpu.memory_space<vmem>>, vector<16x32xf32>
    tpu.vector_store %arg4[%c0_5, %c0_6], %5 {strides = array<i32>} : memref<16x32xf32, #tpu.memory_space<vmem>>, vector<16x32xf32>,
    return
  }
  func.func @transform_0(%arg0: i32) -> (i32, i32) {
    %c0_i32 = arith.constant 0 : i32
    %c0_i32_0 = arith.constant 0 : i32
    return %arg0, %c0_i32 : i32, i32
  }
  func.func @transform_1(%arg0: i32) -> (i32, i32) {
    %c0_i32 = arith.constant 0 : i32
    %c0_i32_0 = arith.constant 0 : i32
    %c0_i32_1 = arith.constant 0 : i32
    return %c0_i32, %c0_i32_0 : i32, i32
  }
  func.func @transform_2(%arg0: i32) -> (i32, i32) {
    %c0_i32 = arith.constant 0 : i32
    %c0_i32_0 = arith.constant 0 : i32
    %c0_i32_1 = arith.constant 0 : i32
    return %c0_i32, %c0_i32_0 : i32, i32
  }
  func.func @transform_3(%arg0: i32) -> (i32, i32) {
    %c0_i32 = arith.constant 0 : i32
    %c0_i32_0 = arith.constant 0 : i32
    return %arg0, %c0_i32 : i32, i32
  }
}

</mosaic_0001>

<bundles_post_ra>
// kernel: tpu_custom_call.1
= control target key start
LH: loop header
LB: loop body
LE: loop exit
PB: predicated region body
PF: predicated region fallthrough
CT: control target
= control target key end

     0   :  { %8 = vsyncpa [#allocation3], 0  ;;  %s340_s0 = inlined_call_operand.hbm [shape: f32[16,32], index: 0, kind: input, shape index: {}]   ;;  %s341_s1 = inlined_call_operand.hbm [shape: f32[32,32], index: 1, kind: input, shape index: {}]   ;;  %s342_s2 = inlined_call_operand.vmem [shape: f32[1,32], index: 2, kind: input, shape index: {}]   ;;  %s343_s3 = inlined_call_operand.hbm [shape: f32[16,32], index: 3, kind: output, shape index: {}]  }
   0x1   :  { %9 = vsyncpa [#allocation6], 0 }
   0x2   :  { %10 = vsyncpa [#allocation4], 0  ;;  %s263_s12 = smov [#allocation2]   ;;  %s191_s16 = scalar_lea.hbm %s340_s0, 256 }
   0x3   :  { %s16_s13 = sshll.u32 %s263_s12, 4  ;;  %p192_p0 = scmp.ne.s32.totalorder %s340_s0, %s191_s16  ;;  %s17_s13 = int_to_ptr.vmem [resolvable:$true] %s16_s13 }
   0x4   :  { %p195_p1 = scmp.lt.u32.totalorder %s191_s16, %s340_s0 }
   0x6   :  { %p197_p2 = pnand %p195_p1, %p192_p0 }
   0x8   :  { %200 = shalt.err (!%p197_p2)
}
   0x9   :  { %s201_s21 = scalar_lea.vmem %s17_s13, 256  ;;  %p206_p4 = scmp.lt.s32.totalorder %s17_s13, %s17_s13 }
   0xa   :  { %p202_p3 = scmp.ne.s32.totalorder %s17_s13, %s201_s21  ;;  %p207_p5 = scmp.lt.s32.totalorder %s201_s21, %s201_s21 }
   0xc   :  { %p208_p6 = por %p207_p5, %p206_p4 }
   0xe   :  { %p209_p7 = pnand %p208_p6, %p202_p3 }
  0x10   :  { %212 = shalt.err (!%p209_p7)
}
  0x11   :  { %s264_s22 = smov 128   ;;  %s265_s23 = smov 8  }
  0x12   :  { %22 = dma.hbm_to_vmem [thread:$0]  %s340_s0, 256, %s17_s13, [#allocation3], %s264_s22, %s264_s22, %s265_s23  }
  0x13   :  { %s266_s26 = smov [#allocation5]   ;;  %s213_s30 = scalar_lea.hbm %s341_s1, 512 }
  0x14   :  { %s28_s27 = sshll.u32 %s266_s26, 4  ;;  %p214_p8 = scmp.ne.s32.totalorder %s341_s1, %s213_s30  ;;  %s29_s27 = int_to_ptr.vmem [resolvable:$true] %s28_s27 }
  0x15   :  { %p217_p9 = scmp.lt.u32.totalorder %s213_s30, %s341_s1 }
  0x17   :  { %p219_p10 = pnand %p217_p9, %p214_p8 }
  0x19   :  { %222 = shalt.err (!%p219_p10)
}
  0x1a   :  { %s223_s8 = scalar_lea.vmem %s29_s27, 512  ;;  %p228_p12 = scmp.lt.s32.totalorder %s29_s27, %s29_s27 }
  0x1b   :  { %p224_p11 = scmp.ne.s32.totalorder %s29_s27, %s223_s8  ;;  %p229_p13 = scmp.lt.s32.totalorder %s223_s8, %s223_s8 }
  0x1d   :  { %p230_p0 = por %p229_p13, %p228_p12 }
  0x1f   :  { %p231_p1 = pnand %p230_p0, %p224_p11 }
  0x21   :  { %234 = shalt.err (!%p231_p1)
}
  0x22   :  { %34 = dma.hbm_to_vmem [thread:$0]  %s341_s1, 512, %s29_s27, [#allocation6], %s264_s22, %s264_s22, %s265_s23  }
  0x23   :  { %257 = dma.done.wait [#allocation3], 256  }
  0x24   :  { %258 = vsyncadd [#allocation3], 4294967040 }
  0x25   :  { %259 = dma.done.wait [#allocation6], 512  }
  0x26   :  { %260 = vsyncadd [#allocation6], 4294966784  ;;  %vm56_vm0 = vcmask 261120   ;;  %v45_v0 = vld [vmem:[#allocation5] sm:$0xff]  ;;  %v46_v1 = vld [vmem:[#allocation5 + $0x8] sm:$0xff]  ;;  %s267_s11 = smov [#allocation7]  }
  0x27   :  { %v47_v2 = vld [vmem:[#allocation5 + $0x10] sm:$0xff]  ;;  %v178_v3 = vpack.c.bf16 %v46_v1, %v45_v0  ;;  %v48_v4 = vld [vmem:[#allocation5 + $0x18] sm:$0xff]  ;;  %s145_s12 = sshll.u32 %s267_s11, 4  ;;  %s146_s12 = int_to_ptr.vmem [resolvable:$true] %s145_s12 }
  0x28   :  { %v43_v5 = vld [vmem:[#allocation2] sm:$0xff]  ;;  %v182_v6 = vpack.c.bf16 %v48_v4, %v47_v2  ;;  %v44_v7 = vld [vmem:[#allocation2 + $0x8] sm:$0xff]  ;;  %s235_s13 = scalar_lea.vmem %s146_s12, 256  ;;  %p240_p3 = scmp.lt.s32.totalorder %s146_s12, %s146_s12 }
  0x29   :  { %175 = vmatprep.mubr.msk.f32.mxu0 %vm56_vm0, %v43_v5  ;;  %179 = vmatprep.subr.bf16.mxu0 %v178_v3  ;;  %v158_v8 = vld [vmem:[%s342_s2] ss:$0 sm:$0xff]  ;;  %p236_p2 = scmp.ne.s32.totalorder %s146_s12, %s235_s13  ;;  %p241_p4 = scmp.lt.s32.totalorder %s235_s13, %s235_s13 }
  0x2a   :  { %181 = vmatpush3.bf16.msra.mxu0 %v178_v3 }
  0x2b   :  { %183 = vmatprep.subr.bf16.mxu0 %v182_v6  ;;  %p242_p5 = por %p241_p4, %p240_p3 }
  0x2d   :  { %p243_p6 = pnand %p242_p5, %p236_p2 }
  0x2e   :  { %185 = vmatpush3.bf16.msra.mxu0 %v182_v6 }
  0x31   :  { %176 = vmatmul.mubr.msk.f32.vlgmr.msra.gmra.mrb[0].mxu0 %vm56_vm0, %v44_v7 }
 0x104   :  { %v177_v9 = vpop.f32.mrb[0].mxu0 }
 0x105   :  { %v135_v10 = vadd.f32 %v177_v9, %v158_v8  ;;  %v129_v11 = vpop.f32.mrb[1].mxu0 }
 0x106   :  { %v130_v12 = vadd.f32 %v158_v8, %v129_v11 }
 0x107   :  { %139 = vst.msk [vmem:[#allocation7 + $0x8] sm:$0xff] %vm56_vm0, %v135_v10 }
 0x108   :  { %138 = vst.msk [vmem:[#allocation7] sm:$0xff] %vm56_vm0, %v130_v12 }
 0x109   :  { %246 = shalt.err (!%p243_p6)
}
 0x10a   :  { %s247_s15 = scalar_lea.hbm %s343_s3, 256 }
 0x10b   :  { %p248_p7 = scmp.ne.s32.totalorder %s343_s3, %s247_s15  ;;  %p251_p8 = scmp.lt.u32.totalorder %s247_s15, %s343_s3 }
 0x10d   :  { %p253_p9 = pnand %p251_p8, %p248_p7 }
 0x10f   :  { %256 = shalt.err (!%p253_p9)
}
 0x110   :  { %151 = dma.vmem_to_hbm [thread:$0]  %s146_s12, 256, %s343_s3, [#allocation4], %s264_s22, %s264_s22, %s265_s23  }
 0x111   :  { %261 = dma.done.wait [#allocation4], 256  }
 0x112   :  { %262 = vsyncadd [#allocation4], 4294967040 }
 0x113   :  { %155 = vsyncpa [#allocation3], 1 }
 0x114   :  { %156 = vsyncpa [#allocation6], 1 }
 0x115   :  { %157 = vsyncpa [#allocation4], 1 }

</bundles_post_ra>
